<compile_context>
chip_gen: v5e
topology: v5e:2x2
jax: 0.10.0
libtpu: 0.0.40
codegen_flags: <defaults>
</compile_context>

<pallas_src>
import jax
import jax.numpy as jnp
from jax.experimental import pallas as pl
from jax.experimental.pallas import tpu as pltpu


def _round_up(x, m):
    return ((x + m - 1) // m) * m


def block_kernel(z_ref, lout_ref, wv_ref, w1_ref, bcat_ref, w2_ref, b2_ref,
                 out_ref):
    lout = lout_ref[...]

    # l1 = v(z) + w1(lOut); the two biases are pre-added into bcat = bv + b1.
    l1 = (jnp.dot(z_ref[...], wv_ref[...], preferred_element_type=jnp.float32)
          + jnp.dot(lout, w1_ref[...], preferred_element_type=jnp.float32)
          + bcat_ref[...])
    a1 = jnp.maximum(l1, 0.0)

    # l2 = w2(a1) + lOut ; a2 = relu(l2)
    l2 = (jnp.dot(a1.astype(w2_ref.dtype), w2_ref[...],
                  preferred_element_type=jnp.float32)
          + b2_ref[...] + lout.astype(jnp.float32))
    out_ref[...] = jnp.maximum(l2, 0.0).astype(out_ref.dtype)


def block_forward(lout, z, wv, bv, w1, b1, w2, b2, *, tb_max=2048):
    """Block.forward.  Weights are stored pre-transposed as (in, out)."""
    B, d_lout = lout.shape
    Bz, d_z = z.shape
    d_out = w2.shape[1]
    assert Bz == B
    assert d_lout == d_out, "residual add in Block requires dLOut == dOut"
    assert wv.shape == (d_z, d_out) and w1.shape == (d_lout, d_out)
    assert w2.shape == (d_out, d_out)

    # ---- batch tiling -------------------------------------------------------
    # Sublane-multiple tiles; aim for >= 2 tiles so v7x's second TC gets work.
    b_pad = _round_up(max(B, 8), 8)
    tb = max(8, min(tb_max, _round_up(pl.cdiv(b_pad, 2), 8)))
    b_pad = _round_up(b_pad, tb)
    n_blocks = b_pad // tb

    if b_pad != B:
        pad = b_pad - B
        z_in = jnp.pad(z, ((0, pad), (0, 0)))
        lout_in = jnp.pad(lout, ((0, pad), (0, 0)))
    else:
        z_in, lout_in = z, lout

    # ---- tiny one-time weight prep ------------------------------------------
    cdt = z.dtype
    wv_c = wv.astype(cdt)
    w1_c = w1.astype(cdt)
    w2_c = w2.astype(cdt)
    b_cat = (bv.reshape(1, d_out).astype(jnp.float32)
             + b1.reshape(1, d_out).astype(jnp.float32))        # bv + b1
    b2r = b2.reshape(1, d_out).astype(jnp.float32)

    flops = 2 * b_pad * (d_z + 2 * d_out) * d_out
    act_isz = jnp.dtype(cdt).itemsize
    bytes_accessed = int(
        act_isz * (z_in.size + lout_in.size + wv_c.size + w1_c.size + w2_c.size)
        + 4 * (b_cat.size + b2r.size)
        + jnp.dtype(lout.dtype).itemsize * b_pad * d_out)

    out = pl.pallas_call(
        block_kernel,
        out_shape=jax.ShapeDtypeStruct((b_pad, d_out), lout.dtype),
        grid=(n_blocks,),
        in_specs=[
            pl.BlockSpec((tb, d_z), lambda i: (i, 0)),        # z, batch-tiled
            pl.BlockSpec((tb, d_out), lambda i: (i, 0)),      # lOut, batch-tiled
            pl.BlockSpec((d_z, d_out), lambda i: (0, 0)),     # Wv, resident
            pl.BlockSpec((d_out, d_out), lambda i: (0, 0)),   # W1, resident
            pl.BlockSpec((1, d_out), lambda i: (0, 0)),       # bv + b1
            pl.BlockSpec((d_out, d_out), lambda i: (0, 0)),   # W2, resident
            pl.BlockSpec((1, d_out), lambda i: (0, 0)),       # b2
        ],
        out_specs=pl.BlockSpec((tb, d_out), lambda i: (i, 0)),
        compiler_params=pltpu.CompilerParams(
            dimension_semantics=("parallel",)),               # shard batch tiles
        cost_estimate=pl.CostEstimate(
            flops=flops, transcendentals=0, bytes_accessed=bytes_accessed),
    )(z_in, lout_in, wv_c, w1_c, b_cat, w2_c, b2r)

    return out[:B] if b_pad != B else out


def reference_forward(lout, z, wv, bv, w1, b1, w2, b2):
    l1 = z @ wv + bv + (lout @ w1 + b1)
    a1 = jnp.maximum(l1, 0.0)
    l2 = a1 @ w2 + b2 + lout
    return jnp.maximum(l2, 0.0)


if __name__ == "__main__":
    # Small shapes consistent with the module. In the original file
    # dZ = 5*5*9 + 1 = 226; dLOut must equal dOut for the residual add.
    B, dZ, dOut = 8, 226, 128
    dLOut = dOut

    key = jax.random.PRNGKey(0)
    k = jax.random.split(key, 8)

    lout = jax.random.normal(k[0], (B, dLOut), dtype=jnp.float32)
    z = jax.random.normal(k[1], (B, dZ), dtype=jnp.float32)

    # Deterministic parameter init (uniform, like torch.nn.Linear default scale).
    def init_linear(kw, kb, fan_in, fan_out):
        bound = 1.0 / jnp.sqrt(float(fan_in))
        W = jax.random.uniform(kw, (fan_in, fan_out), jnp.float32, -bound, bound)
        b = jax.random.uniform(kb, (1, fan_out), jnp.float32, -bound, bound)
        return W, b

    wv, bv = init_linear(k[2], k[3], dZ, dOut)     # self.v : Linear(dZ, dOut)
    w1, b1 = init_linear(k[4], k[5], dLOut, dOut)  # self.w1: Linear(dLOut, dOut)
    w2, b2 = init_linear(k[6], k[7], dOut, dOut)   # self.w2: Linear(dOut, dOut)

    out = block_forward(lout, z, wv, bv, w1, b1, w2, b2)
    out = jax.block_until_ready(out)

    ref = reference_forward(lout, z, wv, bv, w1, b1, w2, b2)
    assert out.shape == (B, dOut)
    assert jnp.allclose(out, ref, atol=1e-4, rtol=1e-4)

    print("KERNEL_OK")
</pallas_src>

<mosaic_0001>
module attributes {stable_mosaic.version = 11 : i64} {
  func.func @block_kernel(%arg0: i32, %arg1: memref<8x226xf32, #tpu.memory_space<vmem>>, %arg2: memref<8x128xf32, #tpu.memory_space<vmem>>, %arg3: memref<226x128xf32, #tpu.memory_space<vmem>>, %arg4: memref<128x128xf32, #tpu.memory_space<vmem>>, %arg5: memref<1x128xf32, #tpu.memory_space<vmem>>, %arg6: memref<128x128xf32, #tpu.memory_space<vmem>>, %arg7: memref<1x128xf32, #tpu.memory_space<vmem>>, %arg8: memref<8x128xf32, #tpu.memory_space<vmem>>) attributes {dimension_semantics = [#tpu.dimension_semantics<parallel>], iteration_bounds = array<i64: 1>, scalar_prefetch = 0 : i64, scratch_operands = 0 : i64, tpu.core_type = #tpu.core_type<tc>, window_params = [{transform_indices = @transform_0, window_bounds = array<i64: 8, 226>}, {transform_indices = @transform_1, window_bounds = array<i64: 8, 128>}, {pipeline_mode = #tpu.pipeline_mode<synchronous>, transform_indices = @transform_2, window_bounds = array<i64: 226, 128>}, {pipeline_mode = #tpu.pipeline_mode<synchronous>, transform_indices = @transform_3, window_bounds = array<i64: 128, 128>}, {pipeline_mode = #tpu.pipeline_mode<synchronous>, transform_indices = @transform_4, window_bounds = array<i64: 1, 128>}, {pipeline_mode = #tpu.pipeline_mode<synchronous>, transform_indices = @transform_5, window_bounds = array<i64: 128, 128>}, {pipeline_mode = #tpu.pipeline_mode<synchronous>, transform_indices = @transform_6, window_bounds = array<i64: 1, 128>}, {transform_indices = @transform_7, window_bounds = array<i64: 8, 128>}]} {
    %c0 = arith.constant 0 : index
    %c0_0 = arith.constant 0 : index
    %0 = vector.load %arg2[%c0, %c0_0] : memref<8x128xf32, #tpu.memory_space<vmem>>, vector<8x128xf32>
    %c0_1 = arith.constant 0 : index
    %c0_2 = arith.constant 0 : index
    %1 = vector.load %arg1[%c0_1, %c0_2] : memref<8x226xf32, #tpu.memory_space<vmem>>, vector<8x226xf32>
    %c0_3 = arith.constant 0 : index
    %c0_4 = arith.constant 0 : index
    %2 = vector.load %arg3[%c0_3, %c0_4] : memref<226x128xf32, #tpu.memory_space<vmem>>, vector<226x128xf32>
    %cst = arith.constant dense<0.000000e+00> : vector<8x128xf32>
    %3 = tpu.matmul %1, %2, %cst {dimension_numbers = #tpu.dot_dimension_numbers<[1], [0], [0], [1], [0, 0, 1, 1], [], []>} : vector<8x226xf32>, vector<226x128xf32>, vector<8x128xf32> -> vector<8x128xf32>
    %c0_5 = arith.constant 0 : index
    %c0_6 = arith.constant 0 : index
    %4 = vector.load %arg4[%c0_5, %c0_6] : memref<128x128xf32, #tpu.memory_space<vmem>>, vector<128x128xf32>
    %cst_7 = arith.constant dense<0.000000e+00> : vector<8x128xf32>
    %5 = tpu.matmul %0, %4, %cst_7 {dimension_numbers = #tpu.dot_dimension_numbers<[1], [0], [0], [1], [0, 0, 1, 1], [], []>} : vector<8x128xf32>, vector<128x128xf32>, vector<8x128xf32> -> vector<8x128xf32>
    %6 = arith.addf %3, %5 : vector<8x128xf32>
    %c0_8 = arith.constant 0 : index
    %c0_9 = arith.constant 0 : index
    %7 = vector.load %arg5[%c0_8, %c0_9] : memref<1x128xf32, #tpu.memory_space<vmem>>, vector<1x128xf32>
    %8 = vector.broadcast %7 : vector<1x128xf32> to vector<8x128xf32>
    %9 = arith.addf %6, %8 : vector<8x128xf32>
    %cst_10 = arith.constant 0.000000e+00 : f32
    %10 = vector.broadcast %cst_10 : f32 to vector<8x128xf32>
    %11 = arith.maximumf %9, %10 : vector<8x128xf32>
    %c0_11 = arith.constant 0 : index
    %c0_12 = arith.constant 0 : index
    %12 = vector.load %arg6[%c0_11, %c0_12] : memref<128x128xf32, #tpu.memory_space<vmem>>, vector<128x128xf32>
    %cst_13 = arith.constant dense<0.000000e+00> : vector<8x128xf32>
    %13 = tpu.matmul %11, %12, %cst_13 {dimension_numbers = #tpu.dot_dimension_numbers<[1], [0], [0], [1], [0, 0, 1, 1], [], []>} : vector<8x128xf32>, vector<128x128xf32>, vector<8x128xf32> -> vector<8x128xf32>
    %c0_14 = arith.constant 0 : index
    %c0_15 = arith.constant 0 : index
    %14 = vector.load %arg7[%c0_14, %c0_15] : memref<1x128xf32, #tpu.memory_space<vmem>>, vector<1x128xf32>
    %15 = vector.broadcast %14 : vector<1x128xf32> to vector<8x128xf32>
    %16 = arith.addf %13, %15 : vector<8x128xf32>
    %17 = arith.addf %16, %0 : vector<8x128xf32>
    %cst_16 = arith.constant 0.000000e+00 : f32
    %18 = vector.broadcast %cst_16 : f32 to vector<8x128xf32>
    %19 = arith.maximumf %17, %18 : vector<8x128xf32>
    %c0_17 = arith.constant 0 : index
    %c0_18 = arith.constant 0 : index
    %20 = vector.load %arg8[%c0_17, %c0_18] : memref<8x128xf32, #tpu.memory_space<vmem>>, vector<8x128xf32>
    tpu.vector_store %arg8[%c0_17, %c0_18], %19 {strides = array<i32>} : memref<8x128xf32, #tpu.memory_space<vmem>>, vector<8x128xf32>,
    return
  }
  func.func @transform_0(%arg0: i32) -> (i32, i32) {
    %c0_i32 = arith.constant 0 : i32
    %c0_i32_0 = arith.constant 0 : i32
    return %arg0, %c0_i32 : i32, i32
  }
  func.func @transform_1(%arg0: i32) -> (i32, i32) {
    %c0_i32 = arith.constant 0 : i32
    %c0_i32_0 = arith.constant 0 : i32
    return %arg0, %c0_i32 : i32, i32
  }
  func.func @transform_2(%arg0: i32) -> (i32, i32) {
    %c0_i32 = arith.constant 0 : i32
    %c0_i32_0 = arith.constant 0 : i32
    %c0_i32_1 = arith.constant 0 : i32
    return %c0_i32, %c0_i32_0 : i32, i32
  }
  func.func @transform_3(%arg0: i32) -> (i32, i32) {
    %c0_i32 = arith.constant 0 : i32
    %c0_i32_0 = arith.constant 0 : i32
    %c0_i32_1 = arith.constant 0 : i32
    return %c0_i32, %c0_i32_0 : i32, i32
  }
  func.func @transform_4(%arg0: i32) -> (i32, i32) {
    %c0_i32 = arith.constant 0 : i32
    %c0_i32_0 = arith.constant 0 : i32
    %c0_i32_1 = arith.constant 0 : i32
    return %c0_i32, %c0_i32_0 : i32, i32
  }
  func.func @transform_5(%arg0: i32) -> (i32, i32) {
    %c0_i32 = arith.constant 0 : i32
    %c0_i32_0 = arith.constant 0 : i32
    %c0_i32_1 = arith.constant 0 : i32
    return %c0_i32, %c0_i32_0 : i32, i32
  }
  func.func @transform_6(%arg0: i32) -> (i32, i32) {
    %c0_i32 = arith.constant 0 : i32
    %c0_i32_0 = arith.constant 0 : i32
    %c0_i32_1 = arith.constant 0 : i32
    return %c0_i32, %c0_i32_0 : i32, i32
  }
  func.func @transform_7(%arg0: i32) -> (i32, i32) {
    %c0_i32 = arith.constant 0 : i32
    %c0_i32_0 = arith.constant 0 : i32
    return %arg0, %c0_i32 : i32, i32
  }
}

</mosaic_0001>

<bundles_post_ra>
// kernel: tpu_custom_call.1
= control target key start
LH: loop header
LB: loop body
LE: loop exit
PB: predicated region body
PF: predicated region fallthrough
CT: control target
= control target key end

     0   :  { %12 = vsyncpa [#allocation3], 0  ;;  %s521_s0 = inlined_call_operand.hbm [shape: f32[8,226], index: 0, kind: input, shape index: {}]   ;;  %s522_s1 = inlined_call_operand.hbm [shape: f32[8,128], index: 1, kind: input, shape index: {}]   ;;  %s523_s2 = inlined_call_operand.hbm [shape: f32[226,128], index: 2, kind: input, shape index: {}]   ;;  %s524_s3 = inlined_call_operand.hbm [shape: f32[128,128], index: 3, kind: input, shape index: {}]   ;;  %s525_s4 = inlined_call_operand.vmem [shape: f32[1,128], index: 4, kind: input, shape index: {}]   ;;  %s526_s5 = inlined_call_operand.hbm [shape: f32[128,128], index: 5, kind: input, shape index: {}]   ;;  %s527_s6 = inlined_call_operand.vmem [shape: f32[1,128], index: 6, kind: input, shape index: {}]   ;;  %s528_s7 = inlined_call_operand.hbm [shape: f32[8,128], index: 7, kind: output, shape index: {}]  }
   0x1   :  { %13 = vsyncpa [#allocation6], 0 }
   0x2   :  { %14 = vsyncpa [#allocation9], 0  ;;  %s32_s26 = sshll.u32 %s522_s1, 4  ;;  %s33_s26 = int_to_ptr.hbm [resolvable:$true] %s32_s26 }
   0x3   :  { %15 = vsyncpa [#allocation4], 0  ;;  %s449_s27 = smov [#allocation5]   ;;  %s55_s8 = sshll.u32 %s524_s3, 4  ;;  %s56_s8 = int_to_ptr.hbm [resolvable:$true] %s55_s8 }
   0x4   :  { %s34_s28 = sshll.u32 %s449_s27, 4  ;;  %s450_s9 = smov [#allocation8]   ;;  %s35_s28 = int_to_ptr.vmem [resolvable:$true] %s34_s28 }
   0x5   :  { %37 = dma.hbm_to_vmem [thread:$0]  %s33_s26, 128, %s35_s28, [#allocation6]  }
   0x6   :  { %s57_s10 = sshll.u32 %s450_s9, 4  ;;  %s21_s13 = sshll.u32 %s521_s0, 4  ;;  %s58_s10 = int_to_ptr.vmem [resolvable:$true] %s57_s10  ;;  %s22_s13 = int_to_ptr.hbm [resolvable:$true] %s21_s13 }
   0x7   :  { %s451_s1 = smov 128   ;;  %s452_s14 = smov 8  }
   0x8   :  { %63 = dma.hbm_to_vmem [thread:$0]  %s56_s8, 2048, %s58_s10, [#allocation9], %s451_s1, %s451_s1, %s452_s14  }
   0x9   :  { %s42_s17 = sshll.u32 %s523_s2, 4  ;;  %s453_s18 = smov [#allocation2]   ;;  %s43_s17 = int_to_ptr.hbm [resolvable:$true] %s42_s17 }
   0xa   :  { %s23_s19 = sshll.u32 %s453_s18, 4  ;;  %s454_s3 = smov [#allocation7]   ;;  %s24_s19 = int_to_ptr.vmem [resolvable:$true] %s23_s19 }
   0xb   :  { %26 = dma.hbm_to_vmem [thread:$0]  %s22_s13, 256, %s24_s19, [#allocation3]  }
   0xc   :  { %s44_s20 = sshll.u32 %s454_s3, 4  ;;  %s70_s0 = sshll.u32 %s526_s5, 4  ;;  %s45_s20 = int_to_ptr.vmem [resolvable:$true] %s44_s20  ;;  %s71_s0 = int_to_ptr.hbm [resolvable:$true] %s70_s0 }
   0xd   :  { %50 = dma.hbm_to_vmem [thread:$0]  %s43_s17, 3712, %s45_s20, [#allocation6], %s451_s1, %s451_s1, %s452_s14  }
   0xe   :  { %s455_s23 = smov [#allocation10]  }
   0xf   :  { %s72_s24 = sshll.u32 %s455_s23, 4  ;;  %s73_s24 = int_to_ptr.vmem [resolvable:$true] %s72_s24 }
  0x10   :  { %78 = dma.hbm_to_vmem [thread:$0]  %s71_s0, 2048, %s73_s24, [#allocation9], %s451_s1, %s451_s1, %s452_s14  }
  0x11   :  { %441 = dma.done.wait [#allocation3], 256  }
  0x12   :  { %442 = vsyncadd [#allocation3], 4294967040 }
  0x13   :  { %443 = dma.done.wait [#allocation6], 3840  }
  0x14   :  { %444 = vsyncadd [#allocation6], 4294963456 }
  0x15   :  { %445 = dma.done.wait [#allocation9], 4096  }
  0x16   :  { %446 = vsyncadd [#allocation9], 4294963200  ;;  %vm173_vm0 = vcmask 1041408   ;;  %v148_v0 = vld [vmem:[#allocation8 + $0x78] sm:$0xff]  ;;  %v119_v1 = vld [vmem:[#allocation7 + $0x78] sm:$0xff]  ;;  %vm169_vm1 = vcmask 801792  }
  0x17   :  { %v147_v2 = vld [vmem:[#allocation8 + $0x70] sm:$0xff]  ;;  %149 = vmatpush.msra.mxu0 %v148_v0  ;;  %177 = vmatpush.msra.mxu1 %v119_v1  ;;  %v118_v3 = vld [vmem:[#allocation7 + $0x70] sm:$0xff]  ;;  %v132_v4 = vld [vmem:[#allocation7 + $0xe0] sm:$0x3]  ;;  %s456_s27 = smov [#allocation11]   ;;  %s273_s8 = sshll.u32 %s528_s7, 4  ;;  %s274_s8 = int_to_ptr.hbm [resolvable:$true] %s273_s8 }
  0x18   :  { %285 = vmatpush.msk.msra.mxu2 %vm173_vm0, %v132_v4  ;;  %v146_v5 = vld [vmem:[#allocation8 + $0x68] sm:$0xff]  ;;  %v117_v6 = vld [vmem:[#allocation7 + $0x68] sm:$0xff]  ;;  %v131_v7 = vld [vmem:[#allocation7 + $0xd8] sm:$0xff]  ;;  %s271_s28 = sshll.u32 %s456_s27, 4  ;;  %s272_s28 = int_to_ptr.vmem [resolvable:$true] %s271_s28 }
  0x19   :  { %150 = vmatpush.msra.mxu0 %v147_v2  ;;  %178 = vmatpush.msra.mxu1 %v118_v3  ;;  %v130_v8 = vld [vmem:[#allocation7 + $0xd0] sm:$0xff]  ;;  %v145_v9 = vld [vmem:[#allocation8 + $0x60] sm:$0xff]  ;;  %v116_v10 = vld [vmem:[#allocation7 + $0x60] sm:$0xff] }
  0x1a   :  { %201 = vmatpush.msra.mxu2 %v131_v7  ;;  %v129_v11 = vld [vmem:[#allocation7 + $0xc8] sm:$0xff]  ;;  %v144_v12 = vld [vmem:[#allocation8 + $0x58] sm:$0xff]  ;;  %v115_v13 = vld [vmem:[#allocation7 + $0x58] sm:$0xff] }
  0x1b   :  { %151 = vmatpush.msra.mxu0 %v146_v5  ;;  %179 = vmatpush.msra.mxu1 %v117_v6  ;;  %v128_v14 = vld [vmem:[#allocation7 + $0xc0] sm:$0xff]  ;;  %v143_v15 = vld [vmem:[#allocation8 + $0x50] sm:$0xff]  ;;  %v114_v16 = vld [vmem:[#allocation7 + $0x50] sm:$0xff] }
  0x1c   :  { %202 = vmatpush.msra.mxu2 %v130_v8  ;;  %v127_v17 = vld [vmem:[#allocation7 + $0xb8] sm:$0xff]  ;;  %v142_v18 = vld [vmem:[#allocation8 + $0x48] sm:$0xff]  ;;  %v113_v19 = vld [vmem:[#allocation7 + $0x48] sm:$0xff] }
  0x1d   :  { %152 = vmatpush.msra.mxu0 %v145_v9  ;;  %180 = vmatpush.msra.mxu1 %v116_v10  ;;  %v126_v20 = vld [vmem:[#allocation7 + $0xb0] sm:$0xff]  ;;  %v141_v21 = vld [vmem:[#allocation8 + $0x40] sm:$0xff]  ;;  %v112_v22 = vld [vmem:[#allocation7 + $0x40] sm:$0xff] }
  0x1e   :  { %203 = vmatpush.msra.mxu2 %v129_v11  ;;  %v125_v23 = vld [vmem:[#allocation7 + $0xa8] sm:$0xff]  ;;  %v140_v24 = vld [vmem:[#allocation8 + $0x38] sm:$0xff]  ;;  %v111_v25 = vld [vmem:[#allocation7 + $0x38] sm:$0xff] }
  0x1f   :  { %153 = vmatpush.msra.mxu0 %v144_v12  ;;  %181 = vmatpush.msra.mxu1 %v115_v13  ;;  %v124_v26 = vld [vmem:[#allocation7 + $0xa0] sm:$0xff]  ;;  %v139_v27 = vld [vmem:[#allocation8 + $0x30] sm:$0xff]  ;;  %v110_v28 = vld [vmem:[#allocation7 + $0x30] sm:$0xff] }
  0x20   :  { %204 = vmatpush.msra.mxu2 %v128_v14  ;;  %v238_v29 = vld [vmem:[#allocation10 + $0x78] sm:$0xff]  ;;  %v123_v30 = vld [vmem:[#allocation7 + $0x98] sm:$0xff]  ;;  %v138_v32 = vld [vmem:[#allocation8 + $0x28] sm:$0xff] }
  0x21   :  { %154 = vmatpush.msra.mxu0 %v143_v15  ;;  %182 = vmatpush.msra.mxu1 %v114_v16  ;;  %v237_v31 = vld [vmem:[#allocation10 + $0x70] sm:$0xff]  ;;  %v109_v33 = vld [vmem:[#allocation7 + $0x28] sm:$0xff]  ;;  %v122_v34 = vld [vmem:[#allocation7 + $0x90] sm:$0xff] }
  0x22   :  { %205 = vmatpush.msra.mxu2 %v127_v17  ;;  %243 = vmatpush.msra.mxu3 %v238_v29  ;;  %v236_v35 = vld [vmem:[#allocation10 + $0x68] sm:$0xff]  ;;  %v137_v36 = vld [vmem:[#allocation8 + $0x20] sm:$0xff]  ;;  %v108_v37 = vld [vmem:[#allocation7 + $0x20] sm:$0xff] }
  0x23   :  { %155 = vmatpush.msra.mxu0 %v142_v18  ;;  %183 = vmatpush.msra.mxu1 %v113_v19  ;;  %v121_v38 = vld [vmem:[#allocation7 + $0x88] sm:$0xff]  ;;  %v136_v40 = vld [vmem:[#allocation8 + $0x18] sm:$0xff]  ;;  %v107_v41 = vld [vmem:[#allocation7 + $0x18] sm:$0xff] }
  0x24   :  { %206 = vmatpush.msra.mxu2 %v126_v20  ;;  %244 = vmatpush.msra.mxu3 %v237_v31  ;;  %v235_v39 = vld [vmem:[#allocation10 + $0x60] sm:$0xff]  ;;  %v120_v42 = vld [vmem:[#allocation7 + $0x80] sm:$0xff]  ;;  %v135_v44 = vld [vmem:[#allocation8 + $0x10] sm:$0xff] }
  0x25   :  { %156 = vmatpush.msra.mxu0 %v141_v21  ;;  %184 = vmatpush.msra.mxu1 %v112_v22  ;;  %v234_v43 = vld [vmem:[#allocation10 + $0x58] sm:$0xff]  ;;  %v106_v45 = vld [vmem:[#allocation7 + $0x10] sm:$0xff]  ;;  %v233_v47 = vld [vmem:[#allocation10 + $0x50] sm:$0xff] }
  0x26   :  { %207 = vmatpush.msra.mxu2 %v125_v23  ;;  %245 = vmatpush.msra.mxu3 %v236_v35  ;;  %v103_v46 = vld [vmem:[#allocation2 + $0x8] sm:$0xff]  ;;  %v105_v49 = vld [vmem:[#allocation7 + $0x8] sm:$0xff]  ;;  %v104_v52 = vld [vmem:[#allocation7] sm:$0xff] }
  0x27   :  { %157 = vmatpush.msra.mxu0 %v140_v24  ;;  %185 = vmatpush.msra.mxu1 %v111_v25  ;;  %v134_v48 = vld [vmem:[#allocation8 + $0x8] sm:$0xff]  ;;  %v133_v51 = vld [vmem:[#allocation8] sm:$0xff]  ;;  %v101_v53 = vld [vmem:[#allocation5] sm:$0xff] }
  0x28   :  { %208 = vmatpush.msra.mxu2 %v124_v26  ;;  %246 = vmatpush.msra.mxu3 %v235_v39  ;;  %v232_v50 = vld [vmem:[#allocation10 + $0x48] sm:$0xff]  ;;  %v102_v54 = vld [vmem:[#allocation2] sm:$0xff]  ;;  %v230_v56 = vld [vmem:[#allocation10 + $0x38] sm:$0xff] }
  0x29   :  { %158 = vmatpush.msra.mxu0 %v139_v27  ;;  %186 = vmatpush.msra.mxu1 %v110_v28  ;;  %v231_v55 = vld [vmem:[#allocation10 + $0x40] sm:$0xff]  ;;  %v229_v57 = vld [vmem:[#allocation10 + $0x30] sm:$0xff]  ;;  %v228_v58 = vld [vmem:[#allocation10 + $0x28] sm:$0xff] }
  0x2a   :  { %209 = vmatpush.msra.mxu2 %v123_v30  ;;  %247 = vmatpush.msra.mxu3 %v234_v43  ;;  %v227_v59 = vld [vmem:[#allocation10 + $0x20] sm:$0xff]  ;;  %v226_v60 = vld [vmem:[#allocation10 + $0x18] sm:$0xff]  ;;  %v225_v61 = vld [vmem:[#allocation10 + $0x10] sm:$0xff] }
  0x2b   :  { %159 = vmatpush.msra.mxu0 %v138_v32  ;;  %187 = vmatpush.msra.mxu1 %v109_v33  ;;  %v224_v62 = vld [vmem:[#allocation10 + $0x8] sm:$0xff]  ;;  %v223_v63 = vld [vmem:[#allocation10] sm:$0xff] }
  0x2c   :  { %210 = vmatpush.msra.mxu2 %v122_v34  ;;  %248 = vmatpush.msra.mxu3 %v233_v47  ;;  %v295_v3 = vld [vmem:[%s525_s4] ss:$0 sm:$0xff] }
  0x2d   :  { %160 = vmatpush.msra.mxu0 %v137_v36  ;;  %188 = vmatpush.msra.mxu1 %v108_v37  ;;  %v296_v8 = vld [vmem:[%s527_s6] ss:$0 sm:$0xff] }
  0x2e   :  { %211 = vmatpush.msra.mxu2 %v121_v38  ;;  %249 = vmatpush.msra.mxu3 %v232_v50 }
  0x2f   :  { %161 = vmatpush.msra.mxu0 %v136_v40  ;;  %189 = vmatpush.msra.mxu1 %v107_v41 }
  0x30   :  { %212 = vmatpush.msra.mxu2 %v120_v42  ;;  %250 = vmatpush.msra.mxu3 %v231_v55 }
  0x31   :  { %162 = vmatpush.msra.mxu0 %v135_v44  ;;  %190 = vmatpush.msra.mxu1 %v106_v45 }
  0x32   :  { %286 = vmatmul.msk.f32.vlgmr.msra.gmra.mxu2 %vm169_vm1, %v103_v46  ;;  %251 = vmatpush.msra.mxu3 %v230_v56 }
  0x33   :  { %163 = vmatpush.msra.mxu0 %v134_v48  ;;  %191 = vmatpush.msra.mxu1 %v105_v49 }
  0x34   :  { %252 = vmatpush.msra.mxu3 %v229_v57 }
  0x35   :  { %164 = vmatpush.msra.mxu0 %v133_v51  ;;  %192 = vmatpush.msra.mxu1 %v104_v52 }
  0x36   :  { %165 = vmatmul.f32.vlgmr.msra.gmra.mxu0 %v101_v53  ;;  %193 = vmatmul.f32.vlgmr.msra.gmra.mxu1 %v102_v54 }
  0x37   :  { %253 = vmatpush.msra.mxu3 %v228_v58 }
  0x39   :  { %254 = vmatpush.msra.mxu3 %v227_v59 }
  0x3b   :  { %255 = vmatpush.msra.mxu3 %v226_v60 }
  0x3d   :  { %256 = vmatpush.msra.mxu3 %v225_v61 }
  0x3f   :  { %257 = vmatpush.msra.mxu3 %v224_v62 }
  0x41   :  { %258 = vmatpush.msra.mxu3 %v223_v63 }
  0xb3   :  { %v166_v0 = vpop.f32.mrf.mxu0  ;;  %v194_v1 = vpop.f32.mrf.mxu1 }
  0xb4   :  { %v195_v2 = vadd.f32 %v194_v1, %v166_v0 }
  0xb5   :  { %v214_v4 = vpop.f32.mrf.mxu2 }
  0xb6   :  { %v215_v5 = vadd.f32 %v214_v4, %v195_v2 }
  0xb8   :  { %v221_v6 = vadd.f32 %v295_v3, %v215_v5 }
  0xba   :  { %v222_v7 = vmax.f32 %v221_v6, 0.0 }
  0xbc   :  { %259 = vmatmul.f32.vlgmr.msra.gmra.mxu3 %v222_v7 }
 0x13f   :  { %v260_v9 = vpop.f32.mrf.mxu3 }
 0x140   :  { %v261_v10 = vadd.f32 %v296_v8, %v260_v9 }
 0x142   :  { %v263_v11 = vadd.f32 %v261_v10, %v101_v53 }
 0x144   :  { %v264_v12 = vmax.f32 %v263_v11, 0.0 }
 0x146   :  { %265 = vst [vmem:[#allocation11] sm:$0xff] %v264_v12 }
 0x147   :  { %276 = dma.vmem_to_hbm [thread:$0]  %s272_s28, 128, %s274_s8, [#allocation4]  }
 0x148   :  { %447 = dma.done.wait [#allocation4], 128  }
 0x149   :  { %448 = vsyncadd [#allocation4], 4294967168 }
 0x14a   :  { %281 = vsyncpa [#allocation3], 1 }
 0x14b   :  { %282 = vsyncpa [#allocation6], 1 }
 0x14c   :  { %283 = vsyncpa [#allocation9], 1 }
 0x14d   :  { %284 = vsyncpa [#allocation4], 1 }

</bundles_post_ra>
